<compile_context>
chip_gen: v7x
topology: tpu7x:2x2x1
jax: 0.10.0
libtpu: 0.0.40
codegen_flags: <defaults>
</compile_context>

<pallas_src>
import functools

import jax
import jax.numpy as jnp
from jax.experimental import pallas as pl
from jax.experimental.pallas import tpu as pltpu


def _round_up(x, m):
    return (x + m - 1) // m * m


# ----------------------------- Pallas kernel ------------------------------- #

def _rgcn_encoder_kernel(a_ref, x_ref, w1_ref, b1_ref, w2_ref, b2_ref,
                         o_ref, y_ref, *, num_proj, n_nodes, cp):
    """Fused 2-layer RGCN encoder. Single grid step; all operands VMEM-resident.

    a_ref : (N, (R+1)*N)   bf16  augmented adjacency  [A_0 | ... | A_{R-1} | I]
    w*_ref: (Cp, (R+1)*Cp) bf16  stacked weights      [W_0 | ... | W_{R-1} | root]
    y_ref : ((R+1)*N, Cp)  bf16  scratch for the re-blocked projections
    """
    a = a_ref[...]                                     # loaded once, reused by both layers

    def conv(x_bf16, w_ref, bias_ref):
        # (1) All per-relation block-diagonal projections AND the root/self
        #     projection in one MXU matmul (lane dim (R+1)*Cp).
        xw = jnp.dot(x_bf16, w_ref[...],
                     preferred_element_type=jnp.float32).astype(jnp.bfloat16)
        # (2) Re-block (N, (R+1)*Cp) -> ((R+1)*N, Cp): static, tile-aligned
        #     copies into scratch (block b = x @ W_b, block R = x @ root).
        for b in range(num_proj):
            y_ref[b * n_nodes:(b + 1) * n_nodes, :] = xw[:, b * cp:(b + 1) * cp]
        # (3) Mean aggregation over ALL relations + root add in ONE matmul
        #     against the augmented adjacency; bias added in f32 on the VPU.
        return jnp.dot(a, y_ref[...],
                       preferred_element_type=jnp.float32) + bias_ref[...]

    h = jnp.maximum(conv(x_ref[...], w1_ref, b1_ref), 0.0)          # relu (f32)
    # TODO(synk): training-mode dropout (p=0.2) not implemented; eval-mode identity.
    out = conv(h.astype(jnp.bfloat16), w2_ref, b2_ref)
    o_ref[...] = out.astype(o_ref.dtype)


# ------------------------------- JAX glue ----------------------------------- #

def build_norm_adjacency(edge_index, edge_type, num_nodes, num_relations):
    """Dense per-relation mean-normalized adjacency: A[r, dst, src]."""
    src, dst = edge_index[0], edge_index[1]
    a = jnp.zeros((num_relations, num_nodes, num_nodes), jnp.float32)
    a = a.at[edge_type, dst, src].add(1.0)
    deg = a.sum(axis=-1, keepdims=True)               # in-degree per (r, dst)
    return a / jnp.maximum(deg, 1.0)                  # scatter-mean (0 if no edges)


def expand_block_diag(w_blocks):
    """(R, B, Cb, Cb) block weights -> (R, C, C) block-diagonal matrices."""
    num_rel, num_blocks, cb, _ = w_blocks.shape
    c = num_blocks * cb
    w_full = jnp.zeros((num_rel, c, c), jnp.float32)
    for b in range(num_blocks):
        w_full = w_full.at[:, b * cb:(b + 1) * cb, b * cb:(b + 1) * cb].set(
            w_blocks[:, b])
    return w_full


def glorot(key, shape):
    fan_in, fan_out = shape[-2], shape[-1]
    limit = (6.0 / (fan_in + fan_out)) ** 0.5
    return jax.random.uniform(key, shape, jnp.float32, -limit, limit)


def init_params(key, num_nodes, hidden, num_relations, num_blocks):
    ks = jax.random.split(key, 5)
    cb = hidden // num_blocks
    return {
        "node_emb": glorot(ks[0], (num_nodes, hidden)),
        "conv1": {
            "w_blocks": glorot(ks[1], (num_relations, num_blocks, cb, cb)),
            "root": glorot(ks[2], (hidden, hidden)),
            "bias": jnp.zeros((1, hidden), jnp.float32),
        },
        "conv2": {
            "w_blocks": glorot(ks[3], (num_relations, num_blocks, cb, cb)),
            "root": glorot(ks[4], (hidden, hidden)),
            "bias": jnp.zeros((1, hidden), jnp.float32),
        },
    }


@functools.partial(jax.jit, static_argnums=(3, 4))
def rgcn_encoder_forward(params, edge_index, edge_type, num_nodes,
                         num_relations):
    """RGCNEncoder.forward in eval mode (dropout p=0.2 is identity)."""
    n, c = params["node_emb"].shape
    cp = _round_up(c, 128)            # lane-dense channel dim (40 -> 128)
    r = num_relations
    nproj = r + 1                     # R relation projections + root/self

    # Augmented, mean-normalized adjacency [A_0 | ... | A_{R-1} | I]: (N, (R+1)*N).
    # TODO(synk): for realistic KG sizes replace the dense O(R*N^2) adjacency
    # with a scalar-prefetch / gather formulation and tile nodes ("parallel").
    a_norm = build_norm_adjacency(edge_index, edge_type, n, r)    # (R, N, N)
    a_aug = jnp.concatenate(
        [a_norm.transpose(1, 0, 2).reshape(n, r * n),
         jnp.eye(n, dtype=jnp.float32)], axis=1).astype(jnp.bfloat16)

    def pad2(x, rows, cols):
        return jnp.pad(x, ((0, rows - x.shape[0]), (0, cols - x.shape[1])))

    x_pad = pad2(params["node_emb"], n, cp).astype(jnp.bfloat16)

    def layer_params(p):
        # TODO(synk): at realistic hidden sizes keep w_blocks unexpanded (the
        # dense expansion DMAs num_blocks x more weight bytes than necessary).
        w_full = expand_block_diag(p["w_blocks"])                     # (R, C, C)
        w_pad = jnp.pad(w_full, ((0, 0), (0, cp - c), (0, cp - c)))   # (R, Cp, Cp)
        w_all = jnp.concatenate(
            [w_pad.transpose(1, 0, 2).reshape(cp, r * cp),
             pad2(p["root"], cp, cp)], axis=1)                        # (Cp, (R+1)*Cp)
        return w_all.astype(jnp.bfloat16), pad2(p["bias"], 1, cp).astype(jnp.float32)

    w1, b1 = layer_params(params["conv1"])
    w2, b2 = layer_params(params["conv2"])

    kernel = functools.partial(_rgcn_encoder_kernel,
                               num_proj=nproj, n_nodes=n, cp=cp)
    out_pad = pl.pallas_call(
        kernel,
        out_shape=jax.ShapeDtypeStruct((n, cp), jnp.float32),
        grid_spec=pltpu.PrefetchScalarGridSpec(
            num_scalar_prefetch=0,
            grid=(1,),     # single step: no relation grid, no accumulator carry
            in_specs=[
                pl.BlockSpec((n, nproj * n), lambda i: (0, 0)),       # augmented A (bf16)
                pl.BlockSpec((n, cp), lambda i: (0, 0)),              # x (bf16, padded)
                pl.BlockSpec((cp, nproj * cp), lambda i: (0, 0)),     # [W_r... | root] layer 1
                pl.BlockSpec((1, cp), lambda i: (0, 0)),              # bias1 (f32)
                pl.BlockSpec((cp, nproj * cp), lambda i: (0, 0)),     # [W_r... | root] layer 2
                pl.BlockSpec((1, cp), lambda i: (0, 0)),              # bias2 (f32)
            ],
            out_specs=pl.BlockSpec((n, cp), lambda i: (0, 0)),        # lane-dense output
            scratch_shapes=[pltpu.VMEM((nproj * n, cp), jnp.bfloat16)],
        ),
        compiler_params=pltpu.CompilerParams(
            dimension_semantics=("arbitrary",),
            vmem_limit_bytes=64 * 1024 * 1024),
    )(a_aug, x_pad, w1, b1, w2, b2)
    return out_pad[:, :c]


def reference_forward(params, edge_index, edge_type, num_nodes, num_relations):
    """Pure-JAX reference in the natural per-relation formulation (independent
    of the kernel's packed operand layout), with the same bf16-input /
    f32-accumulation policy."""
    a = build_norm_adjacency(edge_index, edge_type, num_nodes, num_relations)
    a_b = a.astype(jnp.bfloat16)

    def conv(x, p, relu):
        w_full = expand_block_diag(p["w_blocks"]).astype(jnp.bfloat16)
        xb = x.astype(jnp.bfloat16)
        out = jnp.dot(xb, p["root"].astype(jnp.bfloat16),
                      preferred_element_type=jnp.float32) + p["bias"]
        for r in range(num_relations):
            agg = jnp.dot(a_b[r], xb, preferred_element_type=jnp.float32)
            out = out + jnp.dot(agg.astype(jnp.bfloat16), w_full[r],
                                preferred_element_type=jnp.float32)
        return jnp.maximum(out, 0.0) if relu else out

    x = conv(params["node_emb"], params["conv1"], True)
    return conv(x, params["conv2"], False)


# --------------------------------- main ------------------------------------- #

if __name__ == "__main__":
    num_nodes = 32
    hidden_channels = 40          # divisible by num_blocks=5
    num_relations = 4
    num_blocks = 5
    num_edges = 80

    key = jax.random.PRNGKey(0)
    k_params, k_src, k_dst, k_type = jax.random.split(key, 4)

    params = init_params(k_params, num_nodes, hidden_channels, num_relations,
                         num_blocks)
    edge_index = jnp.stack([
        jax.random.randint(k_src, (num_edges,), 0, num_nodes),
        jax.random.randint(k_dst, (num_edges,), 0, num_nodes),
    ])
    edge_type = jax.random.randint(k_type, (num_edges,), 0, num_relations)

    out = rgcn_encoder_forward(params, edge_index, edge_type, num_nodes,
                               num_relations)
    out = jax.block_until_ready(out)

    ref = reference_forward(params, edge_index, edge_type, num_nodes,
                            num_relations)
    assert out.shape == (num_nodes, hidden_channels)
    # Kernel and reference round intermediates to bf16 at different points
    # (kernel: x@W_b; reference: A_r@x), so allow a small bf16-level slack.
    assert jnp.allclose(out, ref, atol=2e-2, rtol=2e-2), "mismatch vs reference"

    print("KERNEL_OK")
</pallas_src>

<mosaic_0001>
module attributes {stable_mosaic.version = 11 : i64} {
  func.func private @main(%arg0: i32) attributes {dimension_semantics = [#tpu.dimension_semantics<core_parallel>], iteration_bounds = array<i64: 2>, tpu.core_type = #tpu.core_type<sc_scalar_subcore>, window_params = []} {
    return
  }
}

module attributes {stable_mosaic.version = 11 : i64} {
  func.func private @main(%arg0: i32) attributes {dimension_semantics = [#tpu.dimension_semantics<core_parallel>], iteration_bounds = array<i64: 2>, tpu.core_type = #tpu.core_type<sc_scalar_subcore>, window_params = []} {
    return
  }
}

module attributes {stable_mosaic.version = 11 : i64} {
  func.func @_rgcn_encoder_kernel(%arg0: i32, %arg1: memref<32x160xbf16, #tpu.memory_space<vmem>>, %arg2: memref<32x128xbf16, #tpu.memory_space<vmem>>, %arg3: memref<128x640xbf16, #tpu.memory_space<vmem>>, %arg4: memref<1x128xf32, #tpu.memory_space<vmem>>, %arg5: memref<128x640xbf16, #tpu.memory_space<vmem>>, %arg6: memref<1x128xf32, #tpu.memory_space<vmem>>, %arg7: memref<32x128xf32, #tpu.memory_space<vmem>>, %arg8: memref<160x128xbf16, #tpu.memory_space<vmem>>) attributes {dimension_semantics = [#tpu.dimension_semantics<arbitrary>], iteration_bounds = array<i64: 1>, scalar_prefetch = 0 : i64, scratch_operands = 1 : i64, tpu.core_type = #tpu.core_type<tc>, window_params = [{pipeline_mode = #tpu.pipeline_mode<synchronous>, transform_indices = @transform_0, window_bounds = array<i64: 32, 160>}, {pipeline_mode = #tpu.pipeline_mode<synchronous>, transform_indices = @transform_1, window_bounds = array<i64: 32, 128>}, {pipeline_mode = #tpu.pipeline_mode<synchronous>, transform_indices = @transform_2, window_bounds = array<i64: 128, 640>}, {pipeline_mode = #tpu.pipeline_mode<synchronous>, transform_indices = @transform_3, window_bounds = array<i64: 1, 128>}, {pipeline_mode = #tpu.pipeline_mode<synchronous>, transform_indices = @transform_4, window_bounds = array<i64: 128, 640>}, {pipeline_mode = #tpu.pipeline_mode<synchronous>, transform_indices = @transform_5, window_bounds = array<i64: 1, 128>}, {pipeline_mode = #tpu.pipeline_mode<synchronous>, transform_indices = @transform_6, window_bounds = array<i64: 32, 128>}]} {
    %c0 = arith.constant 0 : index
    %c0_0 = arith.constant 0 : index
    %0 = vector.load %arg1[%c0, %c0_0] : memref<32x160xbf16, #tpu.memory_space<vmem>>, vector<32x160xbf16>
    %c0_1 = arith.constant 0 : index
    %c0_2 = arith.constant 0 : index
    %1 = vector.load %arg2[%c0_1, %c0_2] : memref<32x128xbf16, #tpu.memory_space<vmem>>, vector<32x128xbf16>
    %c0_3 = arith.constant 0 : index
    %c0_4 = arith.constant 0 : index
    %2 = vector.load %arg3[%c0_3, %c0_4] : memref<128x640xbf16, #tpu.memory_space<vmem>>, vector<128x640xbf16>
    %cst = arith.constant dense<0.000000e+00> : vector<32x640xf32>
    %3 = tpu.matmul %1, %2, %cst {dimension_numbers = #tpu.dot_dimension_numbers<[1], [0], [0], [1], [0, 0, 1, 1], [], []>} : vector<32x128xbf16>, vector<128x640xbf16>, vector<32x640xf32> -> vector<32x640xf32>
    %4 = arith.truncf %3 : vector<32x640xf32> to vector<32x640xbf16>
    %5 = vector.extract_strided_slice %4 {offsets = [0, 0], sizes = [32, 128], strides = [1, 1]} : vector<32x640xbf16> to vector<32x128xbf16>
    %c0_5 = arith.constant 0 : index
    %c0_6 = arith.constant 0 : index
    %6 = vector.load %arg8[%c0_5, %c0_6] : memref<160x128xbf16, #tpu.memory_space<vmem>>, vector<32x128xbf16>
    tpu.vector_store %arg8[%c0_5, %c0_6], %5 {strides = array<i32>} : memref<160x128xbf16, #tpu.memory_space<vmem>>, vector<32x128xbf16>,
    %7 = vector.extract_strided_slice %4 {offsets = [0, 128], sizes = [32, 128], strides = [1, 1]} : vector<32x640xbf16> to vector<32x128xbf16>
    %c32 = arith.constant 32 : index
    %c0_7 = arith.constant 0 : index
    %8 = vector.load %arg8[%c32, %c0_7] : memref<160x128xbf16, #tpu.memory_space<vmem>>, vector<32x128xbf16>
    tpu.vector_store %arg8[%c32, %c0_7], %7 {strides = array<i32>} : memref<160x128xbf16, #tpu.memory_space<vmem>>, vector<32x128xbf16>,
    %9 = vector.extract_strided_slice %4 {offsets = [0, 256], sizes = [32, 128], strides = [1, 1]} : vector<32x640xbf16> to vector<32x128xbf16>
    %c64 = arith.constant 64 : index
    %c0_8 = arith.constant 0 : index
    %10 = vector.load %arg8[%c64, %c0_8] : memref<160x128xbf16, #tpu.memory_space<vmem>>, vector<32x128xbf16>
    tpu.vector_store %arg8[%c64, %c0_8], %9 {strides = array<i32>} : memref<160x128xbf16, #tpu.memory_space<vmem>>, vector<32x128xbf16>,
    %11 = vector.extract_strided_slice %4 {offsets = [0, 384], sizes = [32, 128], strides = [1, 1]} : vector<32x640xbf16> to vector<32x128xbf16>
    %c96 = arith.constant 96 : index
    %c0_9 = arith.constant 0 : index
    %12 = vector.load %arg8[%c96, %c0_9] : memref<160x128xbf16, #tpu.memory_space<vmem>>, vector<32x128xbf16>
    tpu.vector_store %arg8[%c96, %c0_9], %11 {strides = array<i32>} : memref<160x128xbf16, #tpu.memory_space<vmem>>, vector<32x128xbf16>,
    %13 = vector.extract_strided_slice %4 {offsets = [0, 512], sizes = [32, 128], strides = [1, 1]} : vector<32x640xbf16> to vector<32x128xbf16>
    %c128 = arith.constant 128 : index
    %c0_10 = arith.constant 0 : index
    %14 = vector.load %arg8[%c128, %c0_10] : memref<160x128xbf16, #tpu.memory_space<vmem>>, vector<32x128xbf16>
    tpu.vector_store %arg8[%c128, %c0_10], %13 {strides = array<i32>} : memref<160x128xbf16, #tpu.memory_space<vmem>>, vector<32x128xbf16>,
    %c0_11 = arith.constant 0 : index
    %c0_12 = arith.constant 0 : index
    %15 = vector.load %arg8[%c0_11, %c0_12] : memref<160x128xbf16, #tpu.memory_space<vmem>>, vector<160x128xbf16>
    %cst_13 = arith.constant dense<0.000000e+00> : vector<32x128xf32>
    %16 = tpu.matmul %0, %15, %cst_13 {dimension_numbers = #tpu.dot_dimension_numbers<[1], [0], [0], [1], [0, 0, 1, 1], [], []>} : vector<32x160xbf16>, vector<160x128xbf16>, vector<32x128xf32> -> vector<32x128xf32>
    %c0_14 = arith.constant 0 : index
    %c0_15 = arith.constant 0 : index
    %17 = vector.load %arg4[%c0_14, %c0_15] : memref<1x128xf32, #tpu.memory_space<vmem>>, vector<1x128xf32>
    %18 = vector.broadcast %17 : vector<1x128xf32> to vector<32x128xf32>
    %19 = arith.addf %16, %18 : vector<32x128xf32>
    %cst_16 = arith.constant 0.000000e+00 : f32
    %20 = vector.broadcast %cst_16 : f32 to vector<32x128xf32>
    %21 = arith.maximumf %19, %20 : vector<32x128xf32>
    %22 = arith.truncf %21 : vector<32x128xf32> to vector<32x128xbf16>
    %c0_17 = arith.constant 0 : index
    %c0_18 = arith.constant 0 : index
    %23 = vector.load %arg5[%c0_17, %c0_18] : memref<128x640xbf16, #tpu.memory_space<vmem>>, vector<128x640xbf16>
    %cst_19 = arith.constant dense<0.000000e+00> : vector<32x640xf32>
    %24 = tpu.matmul %22, %23, %cst_19 {dimension_numbers = #tpu.dot_dimension_numbers<[1], [0], [0], [1], [0, 0, 1, 1], [], []>} : vector<32x128xbf16>, vector<128x640xbf16>, vector<32x640xf32> -> vector<32x640xf32>
    %25 = arith.truncf %24 : vector<32x640xf32> to vector<32x640xbf16>
    %26 = vector.extract_strided_slice %25 {offsets = [0, 0], sizes = [32, 128], strides = [1, 1]} : vector<32x640xbf16> to vector<32x128xbf16>
    %c0_20 = arith.constant 0 : index
    %c0_21 = arith.constant 0 : index
    %27 = vector.load %arg8[%c0_20, %c0_21] : memref<160x128xbf16, #tpu.memory_space<vmem>>, vector<32x128xbf16>
    tpu.vector_store %arg8[%c0_20, %c0_21], %26 {strides = array<i32>} : memref<160x128xbf16, #tpu.memory_space<vmem>>, vector<32x128xbf16>,
    %28 = vector.extract_strided_slice %25 {offsets = [0, 128], sizes = [32, 128], strides = [1, 1]} : vector<32x640xbf16> to vector<32x128xbf16>
    %c32_22 = arith.constant 32 : index
    %c0_23 = arith.constant 0 : index
    %29 = vector.load %arg8[%c32_22, %c0_23] : memref<160x128xbf16, #tpu.memory_space<vmem>>, vector<32x128xbf16>
    tpu.vector_store %arg8[%c32_22, %c0_23], %28 {strides = array<i32>} : memref<160x128xbf16, #tpu.memory_space<vmem>>, vector<32x128xbf16>,
    %30 = vector.extract_strided_slice %25 {offsets = [0, 256], sizes = [32, 128], strides = [1, 1]} : vector<32x640xbf16> to vector<32x128xbf16>
    %c64_24 = arith.constant 64 : index
    %c0_25 = arith.constant 0 : index
    %31 = vector.load %arg8[%c64_24, %c0_25] : memref<160x128xbf16, #tpu.memory_space<vmem>>, vector<32x128xbf16>
    tpu.vector_store %arg8[%c64_24, %c0_25], %30 {strides = array<i32>} : memref<160x128xbf16, #tpu.memory_space<vmem>>, vector<32x128xbf16>,
    %32 = vector.extract_strided_slice %25 {offsets = [0, 384], sizes = [32, 128], strides = [1, 1]} : vector<32x640xbf16> to vector<32x128xbf16>
    %c96_26 = arith.constant 96 : index
    %c0_27 = arith.constant 0 : index
    %33 = vector.load %arg8[%c96_26, %c0_27] : memref<160x128xbf16, #tpu.memory_space<vmem>>, vector<32x128xbf16>
    tpu.vector_store %arg8[%c96_26, %c0_27], %32 {strides = array<i32>} : memref<160x128xbf16, #tpu.memory_space<vmem>>, vector<32x128xbf16>,
    %34 = vector.extract_strided_slice %25 {offsets = [0, 512], sizes = [32, 128], strides = [1, 1]} : vector<32x640xbf16> to vector<32x128xbf16>
    %c128_28 = arith.constant 128 : index
    %c0_29 = arith.constant 0 : index
    %35 = vector.load %arg8[%c128_28, %c0_29] : memref<160x128xbf16, #tpu.memory_space<vmem>>, vector<32x128xbf16>
    tpu.vector_store %arg8[%c128_28, %c0_29], %34 {strides = array<i32>} : memref<160x128xbf16, #tpu.memory_space<vmem>>, vector<32x128xbf16>,
    %c0_30 = arith.constant 0 : index
    %c0_31 = arith.constant 0 : index
    %36 = vector.load %arg8[%c0_30, %c0_31] : memref<160x128xbf16, #tpu.memory_space<vmem>>, vector<160x128xbf16>
    %cst_32 = arith.constant dense<0.000000e+00> : vector<32x128xf32>
    %37 = tpu.matmul %0, %36, %cst_32 {dimension_numbers = #tpu.dot_dimension_numbers<[1], [0], [0], [1], [0, 0, 1, 1], [], []>} : vector<32x160xbf16>, vector<160x128xbf16>, vector<32x128xf32> -> vector<32x128xf32>
    %c0_33 = arith.constant 0 : index
    %c0_34 = arith.constant 0 : index
    %38 = vector.load %arg6[%c0_33, %c0_34] : memref<1x128xf32, #tpu.memory_space<vmem>>, vector<1x128xf32>
    %39 = vector.broadcast %38 : vector<1x128xf32> to vector<32x128xf32>
    %40 = arith.addf %37, %39 : vector<32x128xf32>
    %c0_35 = arith.constant 0 : index
    %c0_36 = arith.constant 0 : index
    %41 = vector.load %arg7[%c0_35, %c0_36] : memref<32x128xf32, #tpu.memory_space<vmem>>, vector<32x128xf32>
    tpu.vector_store %arg7[%c0_35, %c0_36], %40 {strides = array<i32>} : memref<32x128xf32, #tpu.memory_space<vmem>>, vector<32x128xf32>,
    return
  }
  func.func @transform_0(%arg0: i32) -> (i32, i32) {
    %c0_i32 = arith.constant 0 : i32
    %c0_i32_0 = arith.constant 0 : i32
    %c0_i32_1 = arith.constant 0 : i32
    return %c0_i32, %c0_i32_0 : i32, i32
  }
  func.func @transform_1(%arg0: i32) -> (i32, i32) {
    %c0_i32 = arith.constant 0 : i32
    %c0_i32_0 = arith.constant 0 : i32
    %c0_i32_1 = arith.constant 0 : i32
    return %c0_i32, %c0_i32_0 : i32, i32
  }
  func.func @transform_2(%arg0: i32) -> (i32, i32) {
    %c0_i32 = arith.constant 0 : i32
    %c0_i32_0 = arith.constant 0 : i32
    %c0_i32_1 = arith.constant 0 : i32
    return %c0_i32, %c0_i32_0 : i32, i32
  }
  func.func @transform_3(%arg0: i32) -> (i32, i32) {
    %c0_i32 = arith.constant 0 : i32
    %c0_i32_0 = arith.constant 0 : i32
    %c0_i32_1 = arith.constant 0 : i32
    return %c0_i32, %c0_i32_0 : i32, i32
  }
  func.func @transform_4(%arg0: i32) -> (i32, i32) {
    %c0_i32 = arith.constant 0 : i32
    %c0_i32_0 = arith.constant 0 : i32
    %c0_i32_1 = arith.constant 0 : i32
    return %c0_i32, %c0_i32_0 : i32, i32
  }
  func.func @transform_5(%arg0: i32) -> (i32, i32) {
    %c0_i32 = arith.constant 0 : i32
    %c0_i32_0 = arith.constant 0 : i32
    %c0_i32_1 = arith.constant 0 : i32
    return %c0_i32, %c0_i32_0 : i32, i32
  }
  func.func @transform_6(%arg0: i32) -> (i32, i32) {
    %c0_i32 = arith.constant 0 : i32
    %c0_i32_0 = arith.constant 0 : i32
    %c0_i32_1 = arith.constant 0 : i32
    return %c0_i32, %c0_i32_0 : i32, i32
  }
}

</mosaic_0001>

<bundles_post_ra>
// kernel: rgcn_encoder_forward.1
= control target key start
LH: loop header
LB: loop body
LE: loop exit
PB: predicated region body
PF: predicated region fallthrough
CT: control target
= control target key end

     0   :  { %11 = vsyncpa [#allocation4], 0  ;;  %s1809_s0 = inlined_call_operand.hbm [shape: bf16[32,160], index: 0, kind: input, shape index: {}]   ;;  %s1810_s1 = inlined_call_operand.hbm [shape: bf16[32,128], index: 1, kind: input, shape index: {}]   ;;  %s1811_s2 = inlined_call_operand.hbm [shape: bf16[128,640], index: 2, kind: input, shape index: {}]   ;;  %s1812_s3 = inlined_call_operand.hbm [shape: f32[1,128], index: 3, kind: input, shape index: {}]   ;;  %s1813_s4 = inlined_call_operand.hbm [shape: bf16[128,640], index: 4, kind: input, shape index: {}]   ;;  %s1814_s5 = inlined_call_operand.hbm [shape: f32[1,128], index: 5, kind: input, shape index: {}]   ;;  %s1815_s6 = inlined_call_operand.hbm [shape: f32[32,128], index: 6, kind: output, shape index: {}]  }
   0x1   :  { %12 = vsyncpa [#allocation7], 0 }
   0x2   :  { %13 = vsyncpa [#allocation10], 0 }
   0x3   :  { %14 = vsyncpa [#allocation13], 0 }
   0x4   :  { %15 = vsyncpa [#allocation5], 0  ;;  %s1622_s21 = smov [#allocation6]   ;;  %s1458_s25 = scalar_lea.hbm %s1810_s1, 256 }
   0x5   :  { %s33_s22 = sshll.u32 %s1622_s21, 4  ;;  %p1459_p0 = scmp.ne.s32.totalorder %s1810_s1, %s1458_s25  ;;  %s34_s22 = int_to_ptr.vmem [resolvable:$true] %s33_s22 }
   0x6   :  { %p1462_p1 = scmp.lt.u32.totalorder %s1458_s25, %s1810_s1 }
   0x8   :  { %p1464_p2 = pnand %p1462_p1, %p1459_p0 }
   0xa   :  { %1467 = shalt.err (!%p1464_p2)
}
   0xb   :  { %s1468_s30 = scalar_lea.vmem %s34_s22, 256  ;;  %p1473_p4 = scmp.lt.s32.totalorder %s34_s22, %s34_s22 }
   0xc   :  { %p1469_p3 = scmp.ne.s32.totalorder %s34_s22, %s1468_s30  ;;  %p1474_p5 = scmp.lt.s32.totalorder %s1468_s30, %s1468_s30 }
   0xe   :  { %p1475_p6 = por %p1474_p5, %p1473_p4 }
  0x10   :  { %p1476_p7 = pnand %p1475_p6, %p1469_p3 }
  0x12   :  { %1479 = shalt.err (!%p1476_p7)
}
  0x13   :  { %s1623_s7 = smov 64   ;;  %s1624_s8 = smov 4  }
  0x14   :  { %39 = dma.hbm_to_vmem [thread:$0]  %s1810_s1, 256, %s34_s22, [#allocation7], %s1623_s7, %s1623_s7, %s1624_s8  }
  0x15   :  { %s1625_s11 = smov [#allocation9]   ;;  %s1626_s13 = smov [#allocation3]  }
  0x16   :  { %s58_s12 = sshll.u32 %s1625_s11, 4  ;;  %s21_s14 = sshll.u32 %s1626_s13, 4  ;;  %s59_s12 = int_to_ptr.vmem [resolvable:$true] %s58_s12  ;;  %s22_s14 = int_to_ptr.vmem [resolvable:$true] %s21_s14 }
  0x17   :  { %s1480_s17 = scalar_lea.hbm %s1812_s3, 16 }
  0x18   :  { %p1481_p8 = scmp.ne.s32.totalorder %s1812_s3, %s1480_s17  ;;  %p1484_p9 = scmp.lt.u32.totalorder %s1480_s17, %s1812_s3 }
  0x1a   :  { %p1486_p10 = pnand %p1484_p9, %p1481_p8 }
  0x1c   :  { %1489 = shalt.err (!%p1486_p10)
}
  0x1d   :  { %s1490_s1 = scalar_lea.vmem %s59_s12, 16  ;;  %s1494_s22 = scalar_lea.vmem %s59_s12, 32 }
  0x1e   :  { %p1491_p11 = scmp.ne.s32.totalorder %s59_s12, %s1490_s1  ;;  %p1495_p12 = scmp.lt.s32.totalorder %s59_s12, %s59_s12 }
  0x1f   :  { %p1496_p13 = scmp.lt.s32.totalorder %s1494_s22, %s1490_s1 }
  0x21   :  { %p1497_p0 = por %p1496_p13, %p1495_p12 }
  0x23   :  { %p1498_p1 = pnand %p1497_p0, %p1491_p11 }
  0x25   :  { %1501 = shalt.err (!%p1498_p1)
}
  0x26   :  { %61 = dma.hbm_to_vmem [thread:$0]  %s1812_s3, 16, %s59_s12, [#allocation10]  }
  0x27   :  { %s1502_s27 = scalar_lea.hbm %s1809_s0, 512 }
  0x28   :  { %p1503_p2 = scmp.ne.s32.totalorder %s1809_s0, %s1502_s27  ;;  %p1506_p3 = scmp.lt.u32.totalorder %s1502_s27, %s1809_s0 }
  0x2a   :  { %p1508_p4 = pnand %p1506_p3, %p1503_p2 }
  0x2c   :  { %1511 = shalt.err (!%p1508_p4)
}
  0x2d   :  { %s1512_s8 = scalar_lea.vmem %s22_s14, 512  ;;  %p1517_p6 = scmp.lt.s32.totalorder %s22_s14, %s22_s14 }
  0x2e   :  { %p1513_p5 = scmp.ne.s32.totalorder %s22_s14, %s1512_s8  ;;  %p1518_p7 = scmp.lt.s32.totalorder %s1512_s8, %s1512_s8 }
  0x30   :  { %p1519_p8 = por %p1518_p7, %p1517_p6 }
  0x32   :  { %p1520_p9 = pnand %p1519_p8, %p1513_p5 }
  0x34   :  { %1523 = shalt.err (!%p1520_p9)
}
  0x35   :  { %s1627_s3 = smov 128   ;;  %s1628_s9 = smov 8  }
  0x36   :  { %27 = dma.hbm_to_vmem [thread:$0]  %s1809_s0, 512, %s22_s14, [#allocation4], %s1627_s3, %s1627_s3, %s1628_s9  }
  0x37   :  { %s1629_s12 = smov [#allocation8]   ;;  %s1524_s17 = scalar_lea.hbm %s1811_s2, 5120 }
  0x38   :  { %s45_s13 = sshll.u32 %s1629_s12, 4  ;;  %p1525_p10 = scmp.ne.s32.totalorder %s1811_s2, %s1524_s17  ;;  %s46_s13 = int_to_ptr.vmem [resolvable:$true] %s45_s13 }
  0x39   :  { %p1528_p11 = scmp.lt.u32.totalorder %s1524_s17, %s1811_s2 }
  0x3b   :  { %p1530_p12 = pnand %p1528_p11, %p1525_p10 }
  0x3d   :  { %1533 = shalt.err (!%p1530_p12)
}
  0x3e   :  { %s1534_s1 = scalar_lea.vmem %s46_s13, 5120  ;;  %p1539_p0 = scmp.lt.s32.totalorder %s46_s13, %s46_s13 }
  0x3f   :  { %p1535_p13 = scmp.ne.s32.totalorder %s46_s13, %s1534_s1  ;;  %p1540_p1 = scmp.lt.s32.totalorder %s1534_s1, %s1534_s1 }
  0x41   :  { %p1541_p2 = por %p1540_p1, %p1539_p0 }
  0x43   :  { %p1542_p3 = pnand %p1541_p2, %p1535_p13 }
  0x45   :  { %1545 = shalt.err (!%p1542_p3)
}
  0x46   :  { %s1630_s0 = smov 320   ;;  %s1631_s14 = smov 20  }
  0x47   :  { %51 = dma.hbm_to_vmem [thread:$0]  %s1811_s2, 5120, %s46_s13, [#allocation7], %s1630_s0, %s1630_s0, %s1631_s14  }
  0x48   :  { %s1632_s24 = smov [#allocation11]   ;;  %s1633_s26 = smov [#allocation12]  }
  0x49   :  { %s67_s25 = sshll.u32 %s1632_s24, 4  ;;  %s80_s27 = sshll.u32 %s1633_s26, 4  ;;  %s68_s25 = int_to_ptr.vmem [resolvable:$true] %s67_s25  ;;  %s81_s27 = int_to_ptr.vmem [resolvable:$true] %s80_s27 }
  0x4a   :  { %s1546_s30 = scalar_lea.hbm %s1813_s4, 5120 }
  0x4b   :  { %p1547_p4 = scmp.ne.s32.totalorder %s1813_s4, %s1546_s30  ;;  %p1550_p5 = scmp.lt.u32.totalorder %s1546_s30, %s1813_s4 }
  0x4d   :  { %p1552_p6 = pnand %p1550_p5, %p1547_p4 }
  0x4f   :  { %1555 = shalt.err (!%p1552_p6)
}
  0x50   :  { %s1556_s2 = scalar_lea.vmem %s68_s25, 5120  ;;  %p1561_p8 = scmp.lt.s32.totalorder %s68_s25, %s68_s25 }
  0x51   :  { %p1557_p7 = scmp.ne.s32.totalorder %s68_s25, %s1556_s2  ;;  %p1562_p9 = scmp.lt.s32.totalorder %s1556_s2, %s1556_s2 }
  0x53   :  { %p1563_p10 = por %p1562_p9, %p1561_p8 }
  0x55   :  { %p1564_p11 = pnand %p1563_p10, %p1557_p7 }
  0x57   :  { %1567 = shalt.err (!%p1564_p11)
}
  0x58   :  { %73 = dma.hbm_to_vmem [thread:$0]  %s1813_s4, 5120, %s68_s25, [#allocation10], %s1630_s0, %s1630_s0, %s1631_s14  }
  0x59   :  { %s1568_s17 = scalar_lea.hbm %s1814_s5, 16 }
  0x5a   :  { %p1569_p12 = scmp.ne.s32.totalorder %s1814_s5, %s1568_s17  ;;  %p1572_p13 = scmp.lt.u32.totalorder %s1568_s17, %s1814_s5 }
  0x5c   :  { %p1574_p0 = pnand %p1572_p13, %p1569_p12 }
  0x5e   :  { %1577 = shalt.err (!%p1574_p0)
}
  0x5f   :  { %s1578_s1 = scalar_lea.vmem %s81_s27, 16  ;;  %s1582_s22 = scalar_lea.vmem %s81_s27, 32 }
  0x60   :  { %p1579_p1 = scmp.ne.s32.totalorder %s81_s27, %s1578_s1  ;;  %p1583_p2 = scmp.lt.s32.totalorder %s81_s27, %s81_s27 }
  0x61   :  { %p1584_p3 = scmp.lt.s32.totalorder %s1582_s22, %s1578_s1 }
  0x63   :  { %p1585_p4 = por %p1584_p3, %p1583_p2 }
  0x65   :  { %p1586_p5 = pnand %p1585_p4, %p1579_p1 }
  0x67   :  { %1589 = shalt.err (!%p1586_p5)
}
  0x68   :  { %83 = dma.hbm_to_vmem [thread:$0]  %s1814_s5, 16, %s81_s27, [#allocation13]  }
  0x69   :  { %1612 = dma.done.wait [#allocation4], 512  }
  0x6a   :  { %1613 = vsyncadd [#allocation4], 4294966784 }
  0x6b   :  { %1614 = dma.done.wait [#allocation7], 5376  }
  0x6c   :  { %1615 = vsyncadd [#allocation7], 4294961920 }
  0x6d   :  { %1616 = dma.done.wait [#allocation10], 5136  }
  0x6e   :  { %1617 = vsyncadd [#allocation10], 4294962160 }
  0x6f   :  { %1618 = dma.done.wait [#allocation13], 16  }
  0x70   :  { %1619 = vsyncadd [#allocation13], 4294967280  ;;  %v1634_v0 = vmov 0   ;;  %v1338_v1 = vld [vmem:[#allocation8 + $0x4] ss:$20 sps:$4 sm:$0xff]   ;;  %v1377_v30 = vld [vmem:[#allocation6] sm:$0xff]  }
  0x71   :  { %411 = vmatprep.mubr.bf16.mxu0 %v1634_v0  ;;  %464 = vmatprep.mubr.bf16.mxu1 %v1634_v0  ;;  %v1340_v2 = vld [vmem:[#allocation8] ss:$20 sps:$4 sm:$0xff]   ;;  %v1343_v4 = vld [vmem:[#allocation8 + $0x28] ss:$20 sps:$4 sm:$0xff]   ;;  %v1346_v8 = vld [vmem:[#allocation8 + $0x50] ss:$20 sps:$4 sm:$0xff]  }
  0x72   :  { %379 = vmatprep.subr.bf16.mxu0 %v1338_v1  ;;  %v1341_v3 = vld [vmem:[#allocation8 + $0x2c] ss:$20 sps:$4 sm:$0xff]   ;;  %v1344_v5 = vld [vmem:[#allocation8 + $0x54] ss:$20 sps:$4 sm:$0xff]   ;;  %v1347_v9 = vld [vmem:[#allocation8 + $0x7c] ss:$20 sps:$4 sm:$0xff]  }
  0x73   :  { %380 = vmatpush1.bf16.msra.mxu0 %v1340_v2  ;;  %v1350_v6 = vld [vmem:[#allocation8 + $0xc] ss:$20 sps:$4 sm:$0xff]   ;;  %v1352_v7 = vld [vmem:[#allocation8 + $0x8] ss:$20 sps:$4 sm:$0xff]   ;;  %v1358_v11 = vld [vmem:[#allocation8 + $0x30] ss:$20 sps:$4 sm:$0xff]  }
  0x74   :  { %381 = vmatprep.subr.bf16.mxu0 %v1341_v3  ;;  %432 = vmatprep.subr.bf16.mxu1 %v1350_v6  ;;  %v1356_v10 = vld [vmem:[#allocation8 + $0x34] ss:$20 sps:$4 sm:$0xff]   ;;  %v1349_v12 = vld [vmem:[#allocation8 + $0x78] ss:$20 sps:$4 sm:$0xff]   ;;  %v1362_v13 = vld [vmem:[#allocation8 + $0x5c] ss:$20 sps:$4 sm:$0xff]  }
  0x75   :  { %433 = vmatpush1.bf16.msra.mxu1 %v1352_v7  ;;  %v1353_v14 = vld [vmem:[#allocation8 + $0xa4] ss:$20 sps:$4 sm:$0xff]   ;;  %v1355_v17 = vld [vmem:[#allocation8 + $0xa0] ss:$20 sps:$4 sm:$0xff]   ;;  %v1361_v21 = vld [vmem:[#allocation8 + $0xc8] ss:$20 sps:$4 sm:$0xff]  }
  0x76   :  { %434 = vmatprep.subr.bf16.mxu1 %v1356_v10  ;;  %v1364_v15 = vld [vmem:[#allocation8 + $0x58] ss:$20 sps:$4 sm:$0xff]   ;;  %v1370_v19 = vld [vmem:[#allocation8 + $0x80] ss:$20 sps:$4 sm:$0xff]   ;;  %v1376_v23 = vld [vmem:[#allocation8 + $0xa8] ss:$20 sps:$4 sm:$0xff]  }
  0x77   :  { %382 = vmatpush1.bf16.msra.mxu0 %v1343_v4  ;;  %v1368_v16 = vld [vmem:[#allocation8 + $0x84] ss:$20 sps:$4 sm:$0xff]   ;;  %v1359_v18 = vld [vmem:[#allocation8 + $0xcc] ss:$20 sps:$4 sm:$0xff]   ;;  %v1365_v22 = vld [vmem:[#allocation8 + $0xf4] ss:$20 sps:$4 sm:$0xff]  }
  0x78   :  { %383 = vmatprep.subr.bf16.mxu0 %v1344_v5  ;;  %v1374_v20 = vld [vmem:[#allocation8 + $0xac] ss:$20 sps:$4 sm:$0xff]   ;;  %v1379_v24 = vld [vmem:[#allocation8 + $0xd4] ss:$20 sps:$4 sm:$0xff]   ;;  %v1367_v25 = vld [vmem:[#allocation8 + $0xf0] ss:$20 sps:$4 sm:$0xff]  }
  0x79   :  { %435 = vmatpush1.bf16.msra.mxu1 %v1358_v11  ;;  %v1371_v26 = vld [vmem:[#allocation8 + $0x11c] ss:$20 sps:$4 sm:$0xff]   ;;  %v1373_v29 = vld [vmem:[#allocation8 + $0x118] ss:$20 sps:$4 sm:$0xff]   ;;  %v1390_v35 = vld [vmem:[#allocation8 + $0x120] ss:$20 sps:$4 sm:$0xff]  }
  0x7a   :  { %436 = vmatprep.subr.bf16.mxu1 %v1362_v13  ;;  %v1381_v27 = vld [vmem:[#allocation8 + $0xd0] ss:$20 sps:$4 sm:$0xff]   ;;  %v1385_v32 = vld [vmem:[#allocation8 + $0xf8] ss:$20 sps:$4 sm:$0xff]   ;;  %v1387_v36 = vld [vmem:[#allocation8 + $0x60] ss:$20 sps:$4 sm:$0xff]  }
  0x7b   :  { %384 = vmatpush1.bf16.msra.mxu0 %v1346_v8  ;;  %v1383_v28 = vld [vmem:[#allocation8 + $0xfc] ss:$20 sps:$4 sm:$0xff]   ;;  %v1382_v33 = vld [vmem:[#allocation8 + $0x38] ss:$20 sps:$4 sm:$0xff]   ;;  %v1394_v41 = vld [vmem:[#allocation8 + $0x100] ss:$20 sps:$4 sm:$0xff]  }
  0x7c   :  { %385 = vmatprep.subr.bf16.mxu0 %v1347_v9  ;;  %v1378_v31 = vld [vmem:[#allocation8 + $0x10] ss:$20 sps:$4 sm:$0xff]   ;;  %v1386_v37 = vld [vmem:[#allocation6 + $0x8] sm:$0xff]   ;;  %vm589_vm0 = vcmask 261120   ;;  %s1635_s5 = smov [#allocation14]  }
  0x7d   :  { %437 = vmatpush1.bf16.msra.mxu1 %v1364_v15  ;;  %v1388_v34 = vld [vmem:[#allocation8 + $0x124] ss:$20 sps:$4 sm:$0xff]   ;;  %v1391_v38 = vld [vmem:[#allocation8 + $0x88] ss:$20 sps:$4 sm:$0xff]   ;;  %s1157_s14 = sshll.u32 %s1635_s5, 4  ;;  %s1158_s14 = int_to_ptr.vmem [resolvable:$true] %s1157_s14 }
  0x7e   :  { %438 = vmatprep.subr.bf16.mxu1 %v1368_v16  ;;  %v1392_v39 = vld [vmem:[#allocation8 + $0xb0] ss:$20 sps:$4 sm:$0xff]   ;;  %v1393_v40 = vld [vmem:[#allocation8 + $0xd8] ss:$20 sps:$4 sm:$0xff]   ;;  %v1395_v42 = vld [vmem:[#allocation8 + $0x128] ss:$20 sps:$4 sm:$0xff]   ;;  %p1595_p7 = scmp.lt.s32.totalorder %s1158_s14, %s1158_s14 }
  0x7f   :  { %386 = vmatpush1.bf16.msra.mxu0 %v1349_v12  ;;  %v1752_v43 = vld [vmem:[#allocation3 + $0x4] ss:$8 sps:$4 sm:$0xff]   ;;  %v1410_v46 = vld [vmem:[#allocation11 + $0x2c] ss:$20 sps:$4 sm:$0xff]   ;;  %s1590_s23 = scalar_lea.vmem %s1158_s14, 512 }
  0x80   :  { %387 = vmatprep.subr.bf16.mxu0 %v1353_v14  ;;  %v1402_v44 = vld [vmem:[#allocation11] ss:$20 sps:$4 sm:$0xff]   ;;  %v1404_v45 = vld [vmem:[#allocation11 + $0x4] ss:$20 sps:$4 sm:$0xff]   ;;  %v1408_v47 = vld [vmem:[#allocation11 + $0x28] ss:$20 sps:$4 sm:$0xff]   ;;  %p1591_p6 = scmp.ne.s32.totalorder %s1158_s14, %s1590_s23  ;;  %p1596_p8 = scmp.lt.s32.totalorder %s1590_s23, %s1590_s23 }
  0x81   :  { %439 = vmatpush1.bf16.msra.mxu1 %v1370_v19  ;;  %v1416_v48 = vld [vmem:[#allocation11 + $0x54] ss:$20 sps:$4 sm:$0xff]   ;;  %v1414_v49 = vld [vmem:[#allocation11 + $0x50] ss:$20 sps:$4 sm:$0xff]   ;;  %v1420_v51 = vld [vmem:[#allocation11 + $0x78] ss:$20 sps:$4 sm:$0xff]  }
  0x82   :  { %440 = vmatprep.subr.bf16.mxu1 %v1374_v20  ;;  %v1422_v50 = vld [vmem:[#allocation11 + $0x7c] ss:$20 sps:$4 sm:$0xff]   ;;  %v1428_v52 = vld [vmem:[#allocation11 + $0xa4] ss:$20 sps:$4 sm:$0xff]   ;;  %v1426_v53 = vld [vmem:[#allocation11 + $0xa0] ss:$20 sps:$4 sm:$0xff]   ;;  %p1597_p9 = por %p1596_p8, %p1595_p7 }
  0x83   :  { %388 = vmatpush1.bf16.msra.mxu0 %v1355_v17  ;;  %v1434_v54 = vld [vmem:[#allocation11 + $0xcc] ss:$20 sps:$4 sm:$0xff]   ;;  %v1432_v55 = vld [vmem:[#allocation11 + $0xc8] ss:$20 sps:$4 sm:$0xff]  }
  0x84   :  { %389 = vmatprep.subr.bf16.mxu0 %v1359_v18  ;;  %p1598_p10 = pnand %p1597_p9, %p1591_p6 }
  0x85   :  { %441 = vmatpush1.bf16.msra.mxu1 %v1376_v23  ;;  %v1407_v23 = vld [vmem:[#allocation11 + $0xc] ss:$20 sps:$4 sm:$0xff]  }
  0x86   :  { %442 = vmatprep.subr.bf16.mxu1 %v1379_v24  ;;  %v1765_v24 = vld [vmem:[#allocation3] ss:$8 sps:$4 sm:$0xff]  }
  0x87   :  { %390 = vmatpush1.bf16.msra.mxu0 %v1361_v21 }
  0x88   :  { %391 = vmatprep.subr.bf16.mxu0 %v1365_v22 }
  0x89   :  { %443 = vmatpush1.bf16.msra.mxu1 %v1381_v27  ;;  %v1413_v27 = vld [vmem:[#allocation11 + $0x34] ss:$20 sps:$4 sm:$0xff]  }
  0x8a   :  { %444 = vmatprep.subr.bf16.mxu1 %v1383_v28  ;;  %v1411_v28 = vld [vmem:[#allocation11 + $0x30] ss:$20 sps:$4 sm:$0xff]  }
  0x8b   :  { %392 = vmatpush1.bf16.msra.mxu0 %v1367_v25  ;;  %v1767_v25 = vld [vmem:[#allocation3 + $0x14] ss:$8 sps:$4 sm:$0xff]  }
  0x8c   :  { %393 = vmatprep.subr.bf16.mxu0 %v1371_v26  ;;  %v1405_v26 = vld [vmem:[#allocation11 + $0x8] ss:$20 sps:$4 sm:$0xff]  }
  0x8d   :  { %445 = vmatpush1.bf16.msra.mxu1 %v1385_v32  ;;  %v1425_v32 = vld [vmem:[#allocation11 + $0x84] ss:$20 sps:$4 sm:$0xff]  }
  0x8e   :  { %446 = vmatprep.subr.bf16.mxu1 %v1388_v34  ;;  %v1431_v34 = vld [vmem:[#allocation11 + $0xac] ss:$20 sps:$4 sm:$0xff]  }
  0x8f   :  { %394 = vmatpush1.bf16.msra.mxu0 %v1373_v29  ;;  %v1419_v29 = vld [vmem:[#allocation11 + $0x5c] ss:$20 sps:$4 sm:$0xff]  }
  0x90   :  { %1284 = vmatprep.subr.bf16.mxu0 %v1378_v31 }
  0x91   :  { %447 = vmatpush1.bf16.msra.mxu1 %v1390_v35  ;;  %v1429_v35 = vld [vmem:[#allocation11 + $0xa8] ss:$20 sps:$4 sm:$0xff]  }
  0x92   :  { %412 = vmatmul.mubr.bf16.vlgmr.msra.gmra.mrb[0].mxu0 %v1377_v30  ;;  %596 = vmatprep.subr.bf16.mxu1 %v1634_v0 }
  0x93   :  { %1285 = vmatpush3.bf16.msra.mxu0 %v1378_v31  ;;  %421 = vmatprep.mubr.bf16.mxu0 %v1634_v0  ;;  %v1417_v31 = vld [vmem:[#allocation11 + $0x58] ss:$20 sps:$4 sm:$0xff]  }
  0x94   :  { %1286 = vmatprep.subr.bf16.mxu0 %v1382_v33  ;;  %465 = vmatmul.mubr.bf16.vlgmr.msra.gmra.mrb[0].mxu1 %v1377_v30 }
  0x95   :  { %474 = vmatprep.mubr.bf16.mxu1 %v1634_v0 }
  0x97   :  { %1287 = vmatpush3.bf16.msra.mxu0 %v1382_v33  ;;  %v1423_v33 = vld [vmem:[#allocation11 + $0x80] ss:$20 sps:$4 sm:$0xff]  }
  0x98   :  { %1288 = vmatprep.subr.bf16.mxu0 %v1387_v36 }
  0x9a   :  { %422 = vmatmul.mubr.bf16.gmra.mrb[4].mxu0 %v1386_v37 }
  0x9b   :  { %1289 = vmatpush3.bf16.msra.mxu0 %v1387_v36  ;;  %1300 = vmatprep.mubr.bf16.mxu0 %v1377_v30  ;;  %v1772_v30 = vld [vmem:[#allocation3 + $0x10] ss:$8 sps:$4 sm:$0xff]  }
  0x9c   :  { %1290 = vmatprep.subr.bf16.mxu0 %v1391_v38  ;;  %475 = vmatmul.mubr.bf16.gmra.mrb[4].mxu1 %v1386_v37  ;;  %v1437_v36 = vld [vmem:[#allocation11 + $0xd4] ss:$20 sps:$4 sm:$0xff]  }
  0x9d   :  { %1219 = vmatprep.mubr.msk.bf16.mxu1 %vm589_vm0, %v1752_v43 }
  0x9f   :  { %1291 = vmatpush3.bf16.msra.mxu0 %v1391_v38  ;;  %v1440_v38 = vld [vmem:[#allocation11 + $0xf4] ss:$20 sps:$4 sm:$0xff]  }
  0xa0   :  { %1292 = vmatprep.subr.bf16.mxu0 %v1392_v39 }
  0xa3   :  { %1293 = vmatpush3.bf16.msra.mxu0 %v1392_v39  ;;  %v1438_v39 = vld [vmem:[#allocation11 + $0xf0] ss:$20 sps:$4 sm:$0xff]  }
  0xa4   :  { %1294 = vmatprep.subr.bf16.mxu0 %v1393_v40 }
  0xa7   :  { %1295 = vmatpush3.bf16.msra.mxu0 %v1393_v40  ;;  %v1443_v40 = vld [vmem:[#allocation11 + $0xfc] ss:$20 sps:$4 sm:$0xff]  }
  0xa8   :  { %1296 = vmatprep.subr.bf16.mxu0 %v1394_v41 }
  0xab   :  { %1297 = vmatpush3.bf16.msra.mxu0 %v1394_v41  ;;  %v1441_v41 = vld [vmem:[#allocation11 + $0xf8] ss:$20 sps:$4 sm:$0xff]  }
  0xac   :  { %1298 = vmatprep.subr.bf16.mxu0 %v1395_v42 }
  0xaf   :  { %1299 = vmatpush3.bf16.msra.mxu0 %v1395_v42  ;;  %v1446_v42 = vld [vmem:[#allocation11 + $0x11c] ss:$20 sps:$4 sm:$0xff]  }
  0xb0   :  { %907 = vmatprep.subr.bf16.mxu0 %v1404_v45  ;;  %v1449_v45 = vld [vmem:[#allocation11 + $0x124] ss:$20 sps:$4 sm:$0xff]  }
  0xb2   :  { %1301 = vmatmul.mubr.bf16.vlgmr.msra.gmra.mrb[8].mxu0 %v1386_v37  ;;  %v1435_v37 = vld [vmem:[#allocation11 + $0xd0] ss:$20 sps:$4 sm:$0xff]  }
  0xb3   :  { %939 = vmatprep.mubr.bf16.mxu0 %v1634_v0  ;;  %908 = vmatpush1.bf16.msra.mxu0 %v1402_v44  ;;  %v1444_v44 = vld [vmem:[#allocation11 + $0x118] ss:$20 sps:$4 sm:$0xff]  }
  0xb4   :  { %909 = vmatprep.subr.bf16.mxu0 %v1410_v46  ;;  %v1447_v46 = vld [vmem:[#allocation11 + $0x120] ss:$20 sps:$4 sm:$0xff]  }
  0xb7   :  { %910 = vmatpush1.bf16.msra.mxu0 %v1408_v47  ;;  %v1450_v47 = vld [vmem:[#allocation11 + $0x10] ss:$20 sps:$4 sm:$0xff]  }
  0xb8   :  { %911 = vmatprep.subr.bf16.mxu0 %v1416_v48  ;;  %v1214_v48 = vld [vmem:[#allocation9] ss:$0 sm:$0xff] }
  0xbb   :  { %912 = vmatpush1.bf16.msra.mxu0 %v1414_v49 }
  0xbc   :  { %913 = vmatprep.subr.bf16.mxu0 %v1422_v50 }
  0xbf   :  { %914 = vmatpush1.bf16.msra.mxu0 %v1420_v51 }
  0xc0   :  { %915 = vmatprep.subr.bf16.mxu0 %v1428_v52 }
  0xc3   :  { %916 = vmatpush1.bf16.msra.mxu0 %v1426_v53 }
  0xc4   :  { %917 = vmatprep.subr.bf16.mxu0 %v1434_v54 }
  0xc7   :  { %918 = vmatpush1.bf16.msra.mxu0 %v1432_v55 }
  0xc8   :  { %919 = vmatprep.subr.bf16.mxu0 %v1440_v38 }
  0xcb   :  { %920 = vmatpush1.bf16.msra.mxu0 %v1438_v39 }
  0xcc   :  { %921 = vmatprep.subr.bf16.mxu0 %v1446_v42 }
  0xcf   :  { %922 = vmatpush1.bf16.msra.mxu0 %v1444_v44  ;;  %v1261_v44 = vld [vmem:[#allocation12] ss:$0 sm:$0xff] }
  0xd0   :  { %1304 = vmatprep.subr.bf16.mxu0 %v1450_v47 }
 0x165   :  { %v413_v56 = vpop.f32.mrb[0].mxu0 }
 0x166   :  { %v415_v57 = vpop.f32.mrb[1].mxu0 }
 0x167   :  { %v417_v58 = vpop.f32.mrb[2].mxu0  ;;  %v466_v62 = vpop.f32.mrb[0].mxu1 }
 0x168   :  { %v534_v59 = vpack.c.bf16 %v417_v58, %v413_v56  ;;  %v419_v60 = vpop.f32.mrb[3].mxu0  ;;  %v468_v63 = vpop.f32.mrb[1].mxu1  ;;  %v1451_v58 = vld [vmem:[#allocation11 + $0x38] ss:$20 sps:$4 sm:$0xff]  }
 0x169   :  { %v535_v61 = vpack.c.bf16 %v419_v60, %v415_v57  ;;  %v470_v2 = vpop.f32.mrb[2].mxu1 }
 0x16a   :  { %597 = vmatpush1.bf16.msra.mxu1 %v534_v59  ;;  %v536_v4 = vpack.c.bf16 %v470_v2, %v466_v62  ;;  %v472_v5 = vpop.f32.mrb[3].mxu1  ;;  %v1452_v2 = vld [vmem:[#allocation11 + $0x60] ss:$20 sps:$4 sm:$0xff]  }
 0x16b   :  { %598 = vmatprep.subr.bf16.mxu1 %v1634_v0  ;;  %v537_v7 = vpack.c.bf16 %v472_v5, %v468_v63 }
 0x16d   :  { %v423_v1 = vpop.f32.mrb[4].mxu0 }
 0x16e   :  { %v425_v3 = vpop.f32.mrb[5].mxu0 }
 0x16f   :  { %v427_v6 = vpop.f32.mrb[6].mxu0  ;;  %v476_v11 = vpop.f32.mrb[4].mxu1 }
 0x170   :  { %v539_v8 = vpack.c.bf16 %v427_v6, %v423_v1  ;;  %v429_v9 = vpop.f32.mrb[7].mxu0  ;;  %v478_v12 = vpop.f32.mrb[5].mxu1  ;;  %v1453_v6 = vld [vmem:[#allocation11 + $0x88] ss:$20 sps:$4 sm:$0xff]  }
 0x171   :  { %v540_v10 = vpack.c.bf16 %v429_v9, %v425_v3  ;;  %v480_v13 = vpop.f32.mrb[6].mxu1  ;;  %v1456_v9 = vld [vmem:[#allocation11 + $0x100] ss:$20 sps:$4 sm:$0xff]  }
 0x172   :  { %599 = vmatpush1.bf16.msra.mxu1 %v539_v8  ;;  %v541_v14 = vpack.c.bf16 %v480_v13, %v476_v11  ;;  %v482_v15 = vpop.f32.mrb[7].mxu1  ;;  %v1455_v8 = vld [vmem:[#allocation11 + $0xd8] ss:$20 sps:$4 sm:$0xff]  }
 0x173   :  { %600 = vmatprep.subr.bf16.mxu1 %v1634_v0  ;;  %v542_v16 = vpack.c.bf16 %v482_v15, %v478_v12 }
 0x176   :  { %601 = vmatpush1.bf16.msra.mxu1 %v535_v61 }
 0x177   :  { %602 = vmatprep.subr.bf16.mxu1 %v1634_v0 }
 0x17a   :  { %603 = vmatpush1.bf16.msra.mxu1 %v540_v10  ;;  %v1457_v10 = vld [vmem:[#allocation11 + $0x128] ss:$20 sps:$4 sm:$0xff]  }
 0x17b   :  { %604 = vmatprep.subr.bf16.mxu1 %v1634_v0 }
 0x17e   :  { %605 = vmatpush1.bf16.msra.mxu1 %v536_v4 }
 0x17f   :  { %606 = vmatprep.subr.bf16.mxu1 %v1634_v0 }
 0x182   :  { %607 = vmatpush1.bf16.msra.mxu1 %v541_v14 }
 0x183   :  { %608 = vmatprep.subr.bf16.mxu1 %v1634_v0 }
 0x185   :  { %v1302_v17 = vpop.f32.mrb[8].mxu0 }
 0x186   :  { %v519_v18 = vpop.f32.mrb[9].mxu0  ;;  %609 = vmatpush1.bf16.msra.mxu1 %v537_v7  ;;  %v1454_v7 = vld [vmem:[#allocation11 + $0xb0] ss:$20 sps:$4 sm:$0xff]  }
 0x187   :  { %v1303_v19 = vpop.f32.mrb[10].mxu0  ;;  %610 = vmatprep.subr.bf16.mxu1 %v1634_v0 }
 0x188   :  { %v543_v20 = vpack.c.bf16 %v1303_v19, %v1302_v17  ;;  %v522_v21 = vpop.f32.mrb[11].mxu0 }
 0x189   :  { %v538_v22 = vpack.c.bf16 %v522_v21, %v519_v18 }
 0x18a   :  { %611 = vmatpush1.bf16.msra.mxu1 %v542_v16 }
 0x18b   :  { %612 = vmatprep.subr.bf16.mxu1 %v1634_v0 }
 0x18e   :  { %613 = vmatpush1.bf16.msra.mxu1 %v538_v22 }
 0x18f   :  { %614 = vmatprep.subr.bf16.mxu1 %v1634_v0 }
 0x192   :  { %615 = vmatpush1.bf16.msra.mxu1 %v543_v20 }
 0x193   :  { %960 = vmatprep.subr.bf16.mxu1 %v1407_v23 }
 0x195   :  { %629 = vmatmul.mubr.bf16.vlgmr.msra.gmra.mrb[8].mxu1 %v1765_v24 }
 0x196   :  { %1220 = vmatprep.mubr.msk.bf16.mxu1 %vm589_vm0, %v1767_v25  ;;  %961 = vmatpush1.bf16.msra.mxu1 %v1405_v26 }
 0x197   :  { %962 = vmatprep.subr.bf16.mxu1 %v1413_v27 }
 0x19a   :  { %963 = vmatpush1.bf16.msra.mxu1 %v1411_v28 }
 0x19b   :  { %964 = vmatprep.subr.bf16.mxu1 %v1419_v29 }
 0x19d   :  { %637 = vmatmul.mubr.bf16.gmra.mrb[12].mxu1 %v1772_v30 }
 0x19e   :  { %965 = vmatpush1.bf16.msra.mxu1 %v1417_v31  ;;  %992 = vmatprep.mubr.bf16.mxu1 %v1634_v0 }
 0x19f   :  { %966 = vmatprep.subr.bf16.mxu1 %v1425_v32 }
 0x1a2   :  { %967 = vmatpush1.bf16.msra.mxu1 %v1423_v33 }
 0x1a3   :  { %968 = vmatprep.subr.bf16.mxu1 %v1431_v34 }
 0x1a6   :  { %969 = vmatpush1.bf16.msra.mxu1 %v1429_v35 }
 0x1a7   :  { %970 = vmatprep.subr.bf16.mxu1 %v1437_v36 }
 0x1aa   :  { %971 = vmatpush1.bf16.msra.mxu1 %v1435_v37 }
 0x1ab   :  { %972 = vmatprep.subr.bf16.mxu1 %v1443_v40 }
 0x1ae   :  { %973 = vmatpush1.bf16.msra.mxu1 %v1441_v41 }
 0x1af   :  { %974 = vmatprep.subr.bf16.mxu1 %v1449_v45 }
 0x1b2   :  { %975 = vmatpush1.bf16.msra.mxu1 %v1447_v46 }
 0x1b3   :  { %1099 = vmatprep.subr.bf16.mxu1 %v1634_v0 }
 0x268   :  { %v630_v49 = vpop.f32.mrb[8].mxu1 }
 0x269   :  { %v631_v50 = vadd.f32 %v1214_v48, %v630_v49  ;;  %v632_v51 = vpop.f32.mrb[9].mxu1 }
 0x26a   :  { %v633_v52 = vpop.f32.mrb[10].mxu1 }
 0x26b   :  { %v634_v53 = vadd.f32 %v1214_v48, %v633_v52  ;;  %v635_v54 = vpop.f32.mrb[11].mxu1  ;;  %v645_v55 = vmax.f32 %v631_v50, 0.0 }
 0x26d   :  { %v646_v56 = vmax.f32 %v634_v53, 0.0 }
 0x26f   :  { %v649_v57 = vpack.c.bf16 %v646_v56, %v645_v55 }
 0x270   :  { %v638_v59 = vpop.f32.mrb[12].mxu1 }
 0x271   :  { %v639_v60 = vadd.f32 %v1214_v48, %v638_v59  ;;  %v640_v61 = vpop.f32.mrb[13].mxu1  ;;  %940 = vmatmul.mubr.bf16.vlgmr.msra.gmra.mrb[12].mxu0 %v649_v57  ;;  %993 = vmatmul.mubr.bf16.vlgmr.msra.gmra.mrb[16].mxu1 %v649_v57 }
 0x272   :  { %1305 = vmatpush3.bf16.msra.mxu0 %v1450_v47  ;;  %v641_v62 = vpop.f32.mrb[14].mxu1  ;;  %949 = vmatprep.mubr.bf16.mxu0 %v1634_v0 }
 0x273   :  { %v642_v63 = vadd.f32 %v1214_v48, %v641_v62  ;;  %v643_v1 = vpop.f32.mrb[15].mxu1  ;;  %1306 = vmatprep.subr.bf16.mxu0 %v1451_v58  ;;  %1002 = vmatprep.mubr.bf16.mxu1 %v1634_v0  ;;  %v647_v3 = vmax.f32 %v639_v60, 0.0 }
 0x275   :  { %v648_v4 = vmax.f32 %v642_v63, 0.0 }
 0x276   :  { %1307 = vmatpush3.bf16.msra.mxu0 %v1451_v58 }
 0x277   :  { %v650_v5 = vpack.c.bf16 %v648_v4, %v647_v3  ;;  %1308 = vmatprep.subr.bf16.mxu0 %v1452_v2 }
 0x279   :  { %950 = vmatmul.mubr.bf16.gmra.mrb[16].mxu0 %v650_v5  ;;  %1003 = vmatmul.mubr.bf16.gmra.mrb[20].mxu1 %v650_v5 }
 0x27a   :  { %1309 = vmatpush3.bf16.msra.mxu0 %v1452_v2  ;;  %1320 = vmatprep.mubr.bf16.mxu0 %v649_v57 }
 0x27b   :  { %1310 = vmatprep.subr.bf16.mxu0 %v1453_v6  ;;  %1262 = vmatprep.mubr.msk.bf16.mxu1 %vm589_vm0, %v1752_v43 }
 0x27e   :  { %1311 = vmatpush3.bf16.msra.mxu0 %v1453_v6 }
 0x27f   :  { %1312 = vmatprep.subr.bf16.mxu0 %v1454_v7 }
 0x282   :  { %1313 = vmatpush3.bf16.msra.mxu0 %v1454_v7 }
 0x283   :  { %1314 = vmatprep.subr.bf16.mxu0 %v1455_v8 }
 0x286   :  { %1315 = vmatpush3.bf16.msra.mxu0 %v1455_v8 }
 0x287   :  { %1316 = vmatprep.subr.bf16.mxu0 %v1456_v9 }
 0x28a   :  { %1317 = vmatpush3.bf16.msra.mxu0 %v1456_v9 }
 0x28b   :  { %1318 = vmatprep.subr.bf16.mxu0 %v1457_v10 }
 0x28e   :  { %1319 = vmatpush3.bf16.msra.mxu0 %v1457_v10 }
 0x291   :  { %1321 = vmatmul.mubr.bf16.vlgmr.msra.gmra.mrb[20].mxu0 %v650_v5 }
 0x344   :  { %v941_v11 = vpop.f32.mrb[12].mxu0  ;;  %v994_v12 = vpop.f32.mrb[16].mxu1 }
 0x345   :  { %v943_v13 = vpop.f32.mrb[13].mxu0  ;;  %v996_v14 = vpop.f32.mrb[17].mxu1 }
 0x346   :  { %v945_v15 = vpop.f32.mrb[14].mxu0  ;;  %v998_v16 = vpop.f32.mrb[18].mxu1 }
 0x347   :  { %v1062_v43 = vpack.c.bf16 %v945_v15, %v941_v11  ;;  %v1064_v17 = vpack.c.bf16 %v998_v16, %v994_v12  ;;  %v947_v18 = vpop.f32.mrb[15].mxu0  ;;  %v1000_v19 = vpop.f32.mrb[19].mxu1 }
 0x348   :  { %v1063_v20 = vpack.c.bf16 %v947_v18, %v943_v13  ;;  %v1065_v21 = vpack.c.bf16 %v1000_v19, %v996_v14 }
 0x349   :  { %1100 = vmatpush1.bf16.msra.mxu1 %v1062_v43 }
 0x34a   :  { %1101 = vmatprep.subr.bf16.mxu1 %v1634_v0 }
 0x34c   :  { %v951_v22 = vpop.f32.mrb[16].mxu0  ;;  %v1004_v23 = vpop.f32.mrb[20].mxu1 }
 0x34d   :  { %v953_v26 = vpop.f32.mrb[17].mxu0  ;;  %v1006_v27 = vpop.f32.mrb[21].mxu1 }
 0x34e   :  { %v955_v28 = vpop.f32.mrb[18].mxu0  ;;  %v1008_v29 = vpop.f32.mrb[22].mxu1 }
 0x34f   :  { %v1067_v31 = vpack.c.bf16 %v955_v28, %v951_v22  ;;  %v1069_v32 = vpack.c.bf16 %v1008_v29, %v1004_v23  ;;  %v957_v33 = vpop.f32.mrb[19].mxu0  ;;  %v1010_v34 = vpop.f32.mrb[23].mxu1 }
 0x350   :  { %v1068_v35 = vpack.c.bf16 %v957_v33, %v953_v26  ;;  %v1070_v36 = vpack.c.bf16 %v1010_v34, %v1006_v27 }
 0x351   :  { %1102 = vmatpush1.bf16.msra.mxu1 %v1067_v31 }
 0x352   :  { %1103 = vmatprep.subr.bf16.mxu1 %v1634_v0 }
 0x355   :  { %1104 = vmatpush1.bf16.msra.mxu1 %v1063_v20 }
 0x356   :  { %1105 = vmatprep.subr.bf16.mxu1 %v1634_v0 }
 0x359   :  { %1106 = vmatpush1.bf16.msra.mxu1 %v1068_v35 }
 0x35a   :  { %1107 = vmatprep.subr.bf16.mxu1 %v1634_v0 }
 0x35d   :  { %1108 = vmatpush1.bf16.msra.mxu1 %v1064_v17 }
 0x35e   :  { %1109 = vmatprep.subr.bf16.mxu1 %v1634_v0 }
 0x361   :  { %1110 = vmatpush1.bf16.msra.mxu1 %v1069_v32 }
 0x362   :  { %1111 = vmatprep.subr.bf16.mxu1 %v1634_v0 }
 0x364   :  { %v1322_v37 = vpop.f32.mrb[20].mxu0 }
 0x365   :  { %v1047_v38 = vpop.f32.mrb[21].mxu0  ;;  %1112 = vmatpush1.bf16.msra.mxu1 %v1065_v21 }
 0x366   :  { %v1323_v39 = vpop.f32.mrb[22].mxu0  ;;  %1113 = vmatprep.subr.bf16.mxu1 %v1634_v0 }
 0x367   :  { %v1071_v40 = vpack.c.bf16 %v1323_v39, %v1322_v37  ;;  %v1050_v41 = vpop.f32.mrb[23].mxu0 }
 0x368   :  { %v1066_v42 = vpack.c.bf16 %v1050_v41, %v1047_v38 }
 0x369   :  { %1114 = vmatpush1.bf16.msra.mxu1 %v1070_v36 }
 0x36a   :  { %1115 = vmatprep.subr.bf16.mxu1 %v1634_v0 }
 0x36d   :  { %1116 = vmatpush1.bf16.msra.mxu1 %v1066_v42 }
 0x36e   :  { %1117 = vmatprep.subr.bf16.mxu1 %v1634_v0 }
 0x371   :  { %1118 = vmatpush1.bf16.msra.mxu1 %v1071_v40 }
 0x374   :  { %1132 = vmatmul.mubr.bf16.vlgmr.msra.gmra.mrb[24].mxu1 %v1765_v24 }
 0x375   :  { %1263 = vmatprep.mubr.msk.bf16.mxu1 %vm589_vm0, %v1767_v25 }
 0x37c   :  { %1140 = vmatmul.mubr.bf16.gmra.mrb[28].mxu1 %v1772_v30 }
 0x447   :  { %v1133_v45 = vpop.f32.mrb[24].mxu1 }
 0x448   :  { %v1134_v46 = vadd.f32 %v1261_v44, %v1133_v45  ;;  %v1135_v47 = vpop.f32.mrb[25].mxu1 }
 0x449   :  { %v1136_v48 = vpop.f32.mrb[26].mxu1 }
 0x44a   :  { %1148 = vst [vmem:[#allocation14] sm:$0xff] %v1134_v46  ;;  %v1137_v49 = vadd.f32 %v1261_v44, %v1136_v48  ;;  %v1138_v50 = vpop.f32.mrb[27].mxu1 }
 0x44c   :  { %1149 = vst [vmem:[#allocation14 + $0x8] sm:$0xff] %v1137_v49 }
 0x44f   :  { %v1141_v51 = vpop.f32.mrb[28].mxu1 }
 0x450   :  { %v1142_v0 = vadd.f32 %v1261_v44, %v1141_v51  ;;  %v1143_v52 = vpop.f32.mrb[29].mxu1 }
 0x451   :  { %v1144_v24 = vpop.f32.mrb[30].mxu1 }
 0x452   :  { %1150 = vst [vmem:[#allocation14 + $0x10] sm:$0xff] %v1142_v0  ;;  %v1145_v53 = vadd.f32 %v1261_v44, %v1144_v24  ;;  %v1146_v25 = vpop.f32.mrb[31].mxu1 }
 0x454   :  { %1151 = vst [vmem:[#allocation14 + $0x18] sm:$0xff] %v1145_v53 }
 0x455   :  { %1601 = shalt.err (!%p1598_p10)
}
 0x456   :  { %s1602_s26 = scalar_lea.hbm %s1815_s6, 512 }
 0x457   :  { %p1603_p11 = scmp.ne.s32.totalorder %s1815_s6, %s1602_s26  ;;  %p1606_p12 = scmp.lt.u32.totalorder %s1602_s26, %s1815_s6 }
 0x459   :  { %p1608_p13 = pnand %p1606_p12, %p1603_p11 }
 0x45b   :  { %1611 = shalt.err (!%p1608_p13)
}
 0x45c   :  { %1163 = dma.vmem_to_hbm [thread:$0]  %s1158_s14, 512, %s1815_s6, [#allocation5], %s1627_s3, %s1627_s3, %s1628_s9  }
 0x45d   :  { %1620 = dma.done.wait [#allocation5], 512  }
 0x45e   :  { %1621 = vsyncadd [#allocation5], 4294966784 }
 0x45f   :  { %1167 = vsyncpa [#allocation4], 1 }
 0x460   :  { %1168 = vsyncpa [#allocation7], 1 }
 0x461   :  { %1169 = vsyncpa [#allocation10], 1 }
 0x462   :  { %1170 = vsyncpa [#allocation13], 1 }
 0x463   :  { %1171 = vsyncpa [#allocation5], 1 }

</bundles_post_ra>
